<compile_context>
chip_gen: v7x
topology: tpu7x:2x2x1
jax: 0.10.0
libtpu: 0.0.40
codegen_flags: <defaults>
</compile_context>

<pallas_src>
import functools

import jax
import jax.numpy as jnp
from jax.experimental import pallas as pl
from jax.experimental.pallas import tpu as pltpu


def _round_up(x, m):
    return (x + m - 1) // m * m


def _msvae_decoder_kernel(z_ref, wh_ref, bh_ref, wcat_ref, bcat_ref,
                          deg_ref, mul_ref, *, d_pad):
    """One (TN, .) row-tile of the decoder forward.

    z_ref    : (TN, L_pad)      bf16
    wh_ref   : (L_pad, H_pad)   bf16      bh_ref : (1, H_pad)     f32
    wcat_ref : (H_pad, 2*D_pad) bf16      bcat_ref: (1, 2*D_pad)  f32
    deg_ref  : (TN, D_pad)      f32       mul_ref : (TN, D_pad)   f32
    """
    z = z_ref[...]

    # hidden = relu(z @ Wh + bh)  -- bf16 operands, f32 accumulate, f32 epilogue
    h = jnp.dot(z, wh_ref[...], preferred_element_type=jnp.float32) + bh_ref[...]
    h = jnp.maximum(h, 0.0)

    # fused degree||multiplicity head: one wide MXU matmul, sliced at a
    # 128-aligned lane boundary.
    logits = (jnp.dot(h.astype(jnp.bfloat16), wcat_ref[...],
                      preferred_element_type=jnp.float32) + bcat_ref[...])
    deg_logits = logits[:, :d_pad]
    mul_logits = logits[:, d_pad:]

    # softmax over degree logits; padded columns carry a -1e30 bias -> exp == 0.
    m = jnp.max(deg_logits, axis=-1, keepdims=True)
    e = jnp.exp(deg_logits - m)
    inv_denom = pl.reciprocal(jnp.sum(e, axis=-1, keepdims=True), approx=True)
    deg_ref[...] = e * inv_denom

    # numerically stable softplus, f32
    mul_ref[...] = (jnp.maximum(mul_logits, 0.0)
                    + jnp.log1p(jnp.exp(-jnp.abs(mul_logits))))


def msvae_decoder_forward(z, params, output_dim=None, *, tile_rows=512):
    """Fused MSVAEDecoder forward. Returns (degrees, multiplicities)."""
    # `output_dim` is accepted for API parity with the PyTorch forward, where it
    # is also unused in the body.
    del output_dim

    n, latent_dim = z.shape
    hidden_dim = params["w_h"].shape[1]
    max_output_dim = params["w_deg"].shape[1]

    l_pad = _round_up(latent_dim, 128)
    h_pad = _round_up(hidden_dim, 128)
    d_pad = _round_up(max_output_dim, 128)

    tn = min(tile_rows, _round_up(n, 8))
    n_pad = _round_up(n, tn)

    # ---- pad + pack parameters (lane-dense, bf16 matmul operands) ----
    wh = jnp.zeros((l_pad, h_pad), jnp.bfloat16)
    wh = wh.at[:latent_dim, :hidden_dim].set(params["w_h"].astype(jnp.bfloat16))
    bh = jnp.zeros((1, h_pad), jnp.float32).at[:, :hidden_dim].set(params["b_h"])

    wcat = jnp.zeros((h_pad, 2 * d_pad), jnp.bfloat16)
    wcat = wcat.at[:hidden_dim, :max_output_dim].set(
        params["w_deg"].astype(jnp.bfloat16))
    wcat = wcat.at[:hidden_dim, d_pad:d_pad + max_output_dim].set(
        params["w_mul"].astype(jnp.bfloat16))

    bcat = jnp.zeros((1, 2 * d_pad), jnp.float32)
    bcat = bcat.at[:, :d_pad].set(-1e30)          # mask padded degree columns
    bcat = bcat.at[:, :max_output_dim].set(params["b_deg"])
    bcat = bcat.at[:, d_pad:d_pad + max_output_dim].set(params["b_mul"])

    z_p = jnp.zeros((n_pad, l_pad), jnp.bfloat16)
    z_p = z_p.at[:n, :latent_dim].set(z.astype(jnp.bfloat16))

    kernel = functools.partial(_msvae_decoder_kernel, d_pad=d_pad)

    deg_p, mul_p = pl.pallas_call(
        kernel,
        out_shape=(jax.ShapeDtypeStruct((n_pad, d_pad), jnp.float32),
                   jax.ShapeDtypeStruct((n_pad, d_pad), jnp.float32)),
        grid=(n_pad // tn,),
        in_specs=[
            pl.BlockSpec((tn, l_pad), lambda i: (i, 0)),        # z row tile
            pl.BlockSpec((l_pad, h_pad), lambda i: (0, 0)),     # Wh (resident)
            pl.BlockSpec((1, h_pad), lambda i: (0, 0)),         # bh (resident)
            pl.BlockSpec((h_pad, 2 * d_pad), lambda i: (0, 0)), # Wdeg||Wmul
            pl.BlockSpec((1, 2 * d_pad), lambda i: (0, 0)),     # bdeg||bmul
        ],
        out_specs=(
            pl.BlockSpec((tn, d_pad), lambda i: (i, 0)),
            pl.BlockSpec((tn, d_pad), lambda i: (i, 0)),
        ),
        compiler_params=pltpu.CompilerParams(
            dimension_semantics=("parallel",)),
    )(z_p, wh, bh, wcat, bcat)

    # strip row / column padding
    return deg_p[:n, :max_output_dim], mul_p[:n, :max_output_dim]


def init_params(key, latent_dim, hidden_dim, max_output_dim):
    """PyTorch nn.Linear-style init; weights stored as (in, out)."""
    def linear(k, fan_in, fan_out):
        kw, kb = jax.random.split(k)
        bound = 1.0 / jnp.sqrt(fan_in)
        w = jax.random.uniform(kw, (fan_in, fan_out), jnp.float32, -bound, bound)
        b = jax.random.uniform(kb, (1, fan_out), jnp.float32, -bound, bound)
        return w, b

    ks = jax.random.split(key, 3)
    w_h, b_h = linear(ks[0], latent_dim, hidden_dim)
    w_deg, b_deg = linear(ks[1], hidden_dim, max_output_dim)
    w_mul, b_mul = linear(ks[2], hidden_dim, max_output_dim)
    return dict(w_h=w_h, b_h=b_h, w_deg=w_deg, b_deg=b_deg,
                w_mul=w_mul, b_mul=b_mul)


def msvae_decoder_ref(z, p):
    """Pure-JAX f32 reference matching the PyTorch module."""
    h = jax.nn.relu(z @ p["w_h"] + p["b_h"])
    degrees = jax.nn.softmax(h @ p["w_deg"] + p["b_deg"], axis=-1)
    multiplicities = jax.nn.softplus(h @ p["w_mul"] + p["b_mul"])
    return degrees, multiplicities


if __name__ == "__main__":
    # Small shapes: 8 latent rows, latent_dim=16, hidden_dim=32, max_output_dim=32
    N, LATENT_DIM, HIDDEN_DIM, MAX_OUTPUT_DIM = 8, 16, 32, 32

    key = jax.random.PRNGKey(0)
    k_param, k_z = jax.random.split(key)

    params = init_params(k_param, LATENT_DIM, HIDDEN_DIM, MAX_OUTPUT_DIM)
    z = jax.random.normal(k_z, (N, LATENT_DIM), jnp.float32)

    degrees, multiplicities = msvae_decoder_forward(
        z, params, output_dim=MAX_OUTPUT_DIM)
    jax.block_until_ready((degrees, multiplicities))

    # sanity check against pure-JAX f32 reference (bf16 operands + approx
    # reciprocal -> relaxed tolerance)
    d_ref, m_ref = msvae_decoder_ref(z, params)
    assert degrees.shape == (N, MAX_OUTPUT_DIM)
    assert multiplicities.shape == (N, MAX_OUTPUT_DIM)
    assert jnp.allclose(degrees, d_ref, atol=2e-2, rtol=2e-2)
    assert jnp.allclose(multiplicities, m_ref, atol=2e-2, rtol=2e-2)
    # padded degree columns must carry zero probability mass
    assert jnp.allclose(jnp.sum(degrees, axis=-1), 1.0, atol=1e-2)

    print("KERNEL_OK")
</pallas_src>

<mosaic_0001>
module attributes {stable_mosaic.version = 11 : i64} {
  func.func @_msvae_decoder_kernel(%arg0: i32, %arg1: memref<8x128xbf16, #tpu.memory_space<vmem>>, %arg2: memref<128x128xbf16, #tpu.memory_space<vmem>>, %arg3: memref<1x128xf32, #tpu.memory_space<vmem>>, %arg4: memref<128x256xbf16, #tpu.memory_space<vmem>>, %arg5: memref<1x256xf32, #tpu.memory_space<vmem>>, %arg6: memref<8x128xf32, #tpu.memory_space<vmem>>, %arg7: memref<8x128xf32, #tpu.memory_space<vmem>>) attributes {dimension_semantics = [#tpu.dimension_semantics<parallel>], iteration_bounds = array<i64: 1>, scalar_prefetch = 0 : i64, scratch_operands = 0 : i64, tpu.core_type = #tpu.core_type<tc>, window_params = [{transform_indices = @transform_0, window_bounds = array<i64: 8, 128>}, {pipeline_mode = #tpu.pipeline_mode<synchronous>, transform_indices = @transform_1, window_bounds = array<i64: 128, 128>}, {pipeline_mode = #tpu.pipeline_mode<synchronous>, transform_indices = @transform_2, window_bounds = array<i64: 1, 128>}, {pipeline_mode = #tpu.pipeline_mode<synchronous>, transform_indices = @transform_3, window_bounds = array<i64: 128, 256>}, {pipeline_mode = #tpu.pipeline_mode<synchronous>, transform_indices = @transform_4, window_bounds = array<i64: 1, 256>}, {transform_indices = @transform_5, window_bounds = array<i64: 8, 128>}, {transform_indices = @transform_6, window_bounds = array<i64: 8, 128>}]} {
    %c0 = arith.constant 0 : index
    %c0_0 = arith.constant 0 : index
    %0 = vector.load %arg1[%c0, %c0_0] : memref<8x128xbf16, #tpu.memory_space<vmem>>, vector<8x128xbf16>
    %c0_1 = arith.constant 0 : index
    %c0_2 = arith.constant 0 : index
    %1 = vector.load %arg2[%c0_1, %c0_2] : memref<128x128xbf16, #tpu.memory_space<vmem>>, vector<128x128xbf16>
    %cst = arith.constant dense<0.000000e+00> : vector<8x128xf32>
    %2 = tpu.matmul %0, %1, %cst {dimension_numbers = #tpu.dot_dimension_numbers<[1], [0], [0], [1], [0, 0, 1, 1], [], []>} : vector<8x128xbf16>, vector<128x128xbf16>, vector<8x128xf32> -> vector<8x128xf32>
    %c0_3 = arith.constant 0 : index
    %c0_4 = arith.constant 0 : index
    %3 = vector.load %arg3[%c0_3, %c0_4] : memref<1x128xf32, #tpu.memory_space<vmem>>, vector<1x128xf32>
    %4 = vector.broadcast %3 : vector<1x128xf32> to vector<8x128xf32>
    %5 = arith.addf %2, %4 : vector<8x128xf32>
    %cst_5 = arith.constant 0.000000e+00 : f32
    %6 = vector.broadcast %cst_5 : f32 to vector<8x128xf32>
    %7 = arith.maximumf %5, %6 : vector<8x128xf32>
    %8 = arith.truncf %7 : vector<8x128xf32> to vector<8x128xbf16>
    %c0_6 = arith.constant 0 : index
    %c0_7 = arith.constant 0 : index
    %9 = vector.load %arg4[%c0_6, %c0_7] : memref<128x256xbf16, #tpu.memory_space<vmem>>, vector<128x256xbf16>
    %cst_8 = arith.constant dense<0.000000e+00> : vector<8x256xf32>
    %10 = tpu.matmul %8, %9, %cst_8 {dimension_numbers = #tpu.dot_dimension_numbers<[1], [0], [0], [1], [0, 0, 1, 1], [], []>} : vector<8x128xbf16>, vector<128x256xbf16>, vector<8x256xf32> -> vector<8x256xf32>
    %c0_9 = arith.constant 0 : index
    %c0_10 = arith.constant 0 : index
    %11 = vector.load %arg5[%c0_9, %c0_10] : memref<1x256xf32, #tpu.memory_space<vmem>>, vector<1x256xf32>
    %12 = vector.broadcast %11 : vector<1x256xf32> to vector<8x256xf32>
    %13 = arith.addf %10, %12 : vector<8x256xf32>
    %14 = vector.extract_strided_slice %13 {offsets = [0, 0], sizes = [8, 128], strides = [1, 1]} : vector<8x256xf32> to vector<8x128xf32>
    %15 = vector.extract_strided_slice %13 {offsets = [0, 128], sizes = [8, 128], strides = [1, 1]} : vector<8x256xf32> to vector<8x128xf32>
    %cst_11 = arith.constant dense<0xFF800000> : vector<8xf32>
    %16 = vector.multi_reduction <maximumf>, %14, %cst_11 [1] : vector<8x128xf32> to vector<8xf32>
    %17 = vector.shape_cast %16 : vector<8xf32> to vector<8x1xf32>
    %18 = vector.broadcast %17 : vector<8x1xf32> to vector<8x128xf32>
    %19 = arith.subf %14, %18 : vector<8x128xf32>
    %20 = math.exp %19 : vector<8x128xf32>
    %cst_12 = arith.constant dense<0.000000e+00> : vector<8xf32>
    %21 = vector.multi_reduction <add>, %20, %cst_12 [1] : vector<8x128xf32> to vector<8xf32>
    %22 = vector.shape_cast %21 : vector<8xf32> to vector<8x1xf32>
    %23 = tpu.reciprocal %22 {approx = true} : vector<8x1xf32> -> vector<8x1xf32>
    %24 = vector.broadcast %23 : vector<8x1xf32> to vector<8x128xf32>
    %25 = arith.mulf %20, %24 : vector<8x128xf32>
    %c0_13 = arith.constant 0 : index
    %c0_14 = arith.constant 0 : index
    %26 = vector.load %arg6[%c0_13, %c0_14] : memref<8x128xf32, #tpu.memory_space<vmem>>, vector<8x128xf32>
    tpu.vector_store %arg6[%c0_13, %c0_14], %25 {strides = array<i32>} : memref<8x128xf32, #tpu.memory_space<vmem>>, vector<8x128xf32>,
    %cst_15 = arith.constant 0.000000e+00 : f32
    %27 = vector.broadcast %cst_15 : f32 to vector<8x128xf32>
    %28 = arith.maximumf %15, %27 : vector<8x128xf32>
    %29 = math.absf %15 : vector<8x128xf32>
    %cst_16 = arith.constant 0.000000e+00 : f32
    %30 = vector.broadcast %cst_16 : f32 to vector<8x128xf32>
    %31 = arith.subf %30, %29 : vector<8x128xf32>
    %32 = math.exp %31 : vector<8x128xf32>
    %33 = math.log1p %32 : vector<8x128xf32>
    %34 = arith.addf %28, %33 : vector<8x128xf32>
    %c0_17 = arith.constant 0 : index
    %c0_18 = arith.constant 0 : index
    %35 = vector.load %arg7[%c0_17, %c0_18] : memref<8x128xf32, #tpu.memory_space<vmem>>, vector<8x128xf32>
    tpu.vector_store %arg7[%c0_17, %c0_18], %34 {strides = array<i32>} : memref<8x128xf32, #tpu.memory_space<vmem>>, vector<8x128xf32>,
    return
  }
  func.func @transform_0(%arg0: i32) -> (i32, i32) {
    %c0_i32 = arith.constant 0 : i32
    %c0_i32_0 = arith.constant 0 : i32
    return %arg0, %c0_i32 : i32, i32
  }
  func.func @transform_1(%arg0: i32) -> (i32, i32) {
    %c0_i32 = arith.constant 0 : i32
    %c0_i32_0 = arith.constant 0 : i32
    %c0_i32_1 = arith.constant 0 : i32
    return %c0_i32, %c0_i32_0 : i32, i32
  }
  func.func @transform_2(%arg0: i32) -> (i32, i32) {
    %c0_i32 = arith.constant 0 : i32
    %c0_i32_0 = arith.constant 0 : i32
    %c0_i32_1 = arith.constant 0 : i32
    return %c0_i32, %c0_i32_0 : i32, i32
  }
  func.func @transform_3(%arg0: i32) -> (i32, i32) {
    %c0_i32 = arith.constant 0 : i32
    %c0_i32_0 = arith.constant 0 : i32
    %c0_i32_1 = arith.constant 0 : i32
    return %c0_i32, %c0_i32_0 : i32, i32
  }
  func.func @transform_4(%arg0: i32) -> (i32, i32) {
    %c0_i32 = arith.constant 0 : i32
    %c0_i32_0 = arith.constant 0 : i32
    %c0_i32_1 = arith.constant 0 : i32
    return %c0_i32, %c0_i32_0 : i32, i32
  }
  func.func @transform_5(%arg0: i32) -> (i32, i32) {
    %c0_i32 = arith.constant 0 : i32
    %c0_i32_0 = arith.constant 0 : i32
    return %arg0, %c0_i32 : i32, i32
  }
  func.func @transform_6(%arg0: i32) -> (i32, i32) {
    %c0_i32 = arith.constant 0 : i32
    %c0_i32_0 = arith.constant 0 : i32
    return %arg0, %c0_i32 : i32, i32
  }
}

</mosaic_0001>

<bundles_post_ra>
// kernel: tpu_custom_call.1
= control target key start
LH: loop header
LB: loop body
LE: loop exit
PB: predicated region body
PF: predicated region fallthrough
CT: control target
= control target key end

     0   :  { %12 = vsyncpa [#allocation3], 0  ;;  %s720_s0 = inlined_call_operand.hbm [shape: bf16[8,128], index: 0, kind: input, shape index: {}]   ;;  %s721_s1 = inlined_call_operand.hbm [shape: bf16[128,128], index: 1, kind: input, shape index: {}]   ;;  %s722_s2 = inlined_call_operand.vmem [shape: f32[1,128], index: 2, kind: input, shape index: {}]   ;;  %s723_s3 = inlined_call_operand.hbm [shape: bf16[128,256], index: 3, kind: input, shape index: {}]   ;;  %s724_s4 = inlined_call_operand.vmem [shape: f32[1,256], index: 4, kind: input, shape index: {}]   ;;  %s725_s5 = inlined_call_operand.hbm [shape: f32[8,128], index: 5, kind: output, shape index: {0}]   ;;  %s726_s6 = inlined_call_operand.hbm [shape: f32[8,128], index: 6, kind: output, shape index: {1}]  }
   0x1   :  { %13 = vsyncpa [#allocation6], 0 }
   0x2   :  { %14 = vsyncpa [#allocation4], 0 }
   0x3   :  { %15 = vsyncpa [#allocation10], 0  ;;  %s607_s21 = smov [#allocation5]   ;;  %s489_s25 = scalar_lea.hbm %s721_s1, 1024 }
   0x4   :  { %s31_s22 = sshll.u32 %s607_s21, 4  ;;  %p490_p0 = scmp.ne.s32.totalorder %s721_s1, %s489_s25  ;;  %s32_s22 = int_to_ptr.vmem [resolvable:$true] %s31_s22 }
   0x5   :  { %p493_p1 = scmp.lt.u32.totalorder %s489_s25, %s721_s1 }
   0x7   :  { %p495_p2 = pnand %p493_p1, %p490_p0 }
   0x9   :  { %498 = shalt.err (!%p495_p2)
}
   0xa   :  { %s499_s30 = scalar_lea.vmem %s32_s22, 1024  ;;  %p504_p4 = scmp.lt.s32.totalorder %s32_s22, %s32_s22 }
   0xb   :  { %p500_p3 = scmp.ne.s32.totalorder %s32_s22, %s499_s30  ;;  %p505_p5 = scmp.lt.s32.totalorder %s499_s30, %s499_s30 }
   0xd   :  { %p506_p6 = por %p505_p5, %p504_p4 }
   0xf   :  { %p507_p7 = pnand %p506_p6, %p500_p3 }
  0x11   :  { %510 = shalt.err (!%p507_p7)
}
  0x12   :  { %s608_s7 = smov 64   ;;  %s609_s8 = smov 4  }
  0x13   :  { %37 = dma.hbm_to_vmem [thread:$0]  %s721_s1, 1024, %s32_s22, [#allocation6], %s608_s7, %s608_s7, %s609_s8  }
  0x14   :  { %s610_s11 = smov [#allocation2]   ;;  %s611_s13 = smov [#allocation7]  }
  0x15   :  { %s22_s12 = sshll.u32 %s610_s11, 4  ;;  %s45_s14 = sshll.u32 %s611_s13, 4  ;;  %s23_s12 = int_to_ptr.vmem [resolvable:$true] %s22_s12  ;;  %s46_s14 = int_to_ptr.vmem [resolvable:$true] %s45_s14 }
  0x16   :  { %s511_s17 = scalar_lea.hbm %s720_s0, 64 }
  0x17   :  { %p512_p8 = scmp.ne.s32.totalorder %s720_s0, %s511_s17  ;;  %p515_p9 = scmp.lt.u32.totalorder %s511_s17, %s720_s0 }
  0x19   :  { %p517_p10 = pnand %p515_p9, %p512_p8 }
  0x1b   :  { %520 = shalt.err (!%p517_p10)
}
  0x1c   :  { %s521_s1 = scalar_lea.vmem %s23_s12, 64  ;;  %p526_p12 = scmp.lt.s32.totalorder %s23_s12, %s23_s12 }
  0x1d   :  { %p522_p11 = scmp.ne.s32.totalorder %s23_s12, %s521_s1  ;;  %p527_p13 = scmp.lt.s32.totalorder %s521_s1, %s521_s1 }
  0x1f   :  { %p528_p0 = por %p527_p13, %p526_p12 }
  0x21   :  { %p529_p1 = pnand %p528_p0, %p522_p11 }
  0x23   :  { %532 = shalt.err (!%p529_p1)
}
  0x24   :  { %25 = dma.hbm_to_vmem [thread:$0]  %s720_s0, 64, %s23_s12, [#allocation3]  }
  0x25   :  { %s533_s26 = scalar_lea.hbm %s723_s3, 2048 }
  0x26   :  { %p534_p2 = scmp.ne.s32.totalorder %s723_s3, %s533_s26  ;;  %p537_p3 = scmp.lt.u32.totalorder %s533_s26, %s723_s3 }
  0x28   :  { %p539_p4 = pnand %p537_p3, %p534_p2 }
  0x2a   :  { %542 = shalt.err (!%p539_p4)
}
  0x2b   :  { %s543_s7 = scalar_lea.vmem %s46_s14, 2048  ;;  %p548_p6 = scmp.lt.s32.totalorder %s46_s14, %s46_s14 }
  0x2c   :  { %p544_p5 = scmp.ne.s32.totalorder %s46_s14, %s543_s7  ;;  %p549_p7 = scmp.lt.s32.totalorder %s543_s7, %s543_s7 }
  0x2e   :  { %p550_p8 = por %p549_p7, %p548_p6 }
  0x30   :  { %p551_p9 = pnand %p550_p8, %p544_p5 }
  0x32   :  { %554 = shalt.err (!%p551_p9)
}
  0x33   :  { %s612_s0 = smov 128   ;;  %s613_s8 = smov 8  }
  0x34   :  { %51 = dma.hbm_to_vmem [thread:$0]  %s723_s3, 2048, %s46_s14, [#allocation6], %s612_s0, %s612_s0, %s613_s8  }
  0x35   :  { %599 = dma.done.wait [#allocation3], 64  }
  0x36   :  { %600 = vsyncadd [#allocation3], 4294967232 }
  0x37   :  { %601 = dma.done.wait [#allocation6], 3072  }
  0x38   :  { %602 = vsyncadd [#allocation6], 4294964224  ;;  %v614_v0 = vmov 0.0   ;;  %vm615_vm0 = vmmov 0   ;;  %v449_v1 = vld [vmem:[#allocation5] sm:$0xff]   ;;  %v450_v2 = vld [vmem:[#allocation5 + $0x8] sm:$0xff]   ;;  %v196_v35 = vlaneseq }
  0x39   :  { %417 = vmatprep.subr.bf16.mxu0 %v614_v0  ;;  %433 = vmatprep.mubr.msk.bf16.mxu0 %vm615_vm0, %v614_v0  ;;  %v451_v3 = vld [vmem:[#allocation5 + $0x10] sm:$0xff]   ;;  %v457_v4 = vld [vmem:[#allocation7 + $0x4] ss:$8 sps:$4 sm:$0xff]   ;;  %v459_v5 = vld [vmem:[#allocation7] ss:$8 sps:$4 sm:$0xff]   ;;  %v616_v26 = vmov 0  }
  0x3a   :  { %418 = vmatpush3.bf16.msra.mxu0 %v449_v1  ;;  %v452_v6 = vld [vmem:[#allocation5 + $0x18] sm:$0xff]   ;;  %286 = vmatprep.subr.bf16.mxu1 %v457_v4  ;;  %v463_v9 = vld [vmem:[#allocation7 + $0x24] ss:$8 sps:$4 sm:$0xff]   ;;  %v465_v11 = vld [vmem:[#allocation7 + $0x20] ss:$8 sps:$4 sm:$0xff]   ;;  %v197_v36 = vshrl.u32 %v196_v35, 7 }
  0x3b   :  { %419 = vmatprep.subr.bf16.mxu0 %v614_v0  ;;  %v460_v7 = vld [vmem:[#allocation7 + $0x14] ss:$8 sps:$4 sm:$0xff]   ;;  %287 = vmatpush1.bf16.msra.mxu1 %v459_v5  ;;  %v462_v8 = vld [vmem:[#allocation7 + $0x10] ss:$8 sps:$4 sm:$0xff]   ;;  %v453_v10 = vld [vmem:[#allocation5 + $0x20] sm:$0xff]  }
  0x3c   :  { %288 = vmatprep.subr.bf16.mxu1 %v460_v7  ;;  %v466_v12 = vld [vmem:[#allocation7 + $0x34] ss:$8 sps:$4 sm:$0xff]   ;;  %v454_v13 = vld [vmem:[#allocation5 + $0x28] sm:$0xff]   ;;  %v468_v14 = vld [vmem:[#allocation7 + $0x30] ss:$8 sps:$4 sm:$0xff]   ;;  %318 = vmatprep.mubr.bf16.mxu1 %v616_v26  ;;  %v198_v37 = vsub.s32 0, %v197_v36 }
  0x3d   :  { %v469_v15 = vld [vmem:[#allocation7 + $0x44] ss:$8 sps:$4 sm:$0xff]   ;;  %v455_v16 = vld [vmem:[#allocation5 + $0x30] sm:$0xff]   ;;  %v471_v17 = vld [vmem:[#allocation7 + $0x40] ss:$8 sps:$4 sm:$0xff]   ;;  %v202_v39 = vsub.s32 1, %v197_v36 }
  0x3e   :  { %420 = vmatpush3.bf16.msra.mxu0 %v450_v2  ;;  %v472_v18 = vld [vmem:[#allocation7 + $0x54] ss:$8 sps:$4 sm:$0xff]   ;;  %v474_v20 = vld [vmem:[#allocation7 + $0x50] ss:$8 sps:$4 sm:$0xff]   ;;  %v475_v21 = vld [vmem:[#allocation7 + $0x64] ss:$8 sps:$4 sm:$0xff]  }
  0x3f   :  { %421 = vmatprep.subr.bf16.mxu0 %v614_v0  ;;  %289 = vmatpush1.bf16.msra.mxu1 %v462_v8  ;;  %v456_v19 = vld [vmem:[#allocation5 + $0x38] sm:$0xff]   ;;  %v477_v23 = vld [vmem:[#allocation7 + $0x60] ss:$8 sps:$4 sm:$0xff]  }
  0x40   :  { %290 = vmatprep.subr.bf16.mxu1 %v463_v9  ;;  %v64_v22 = vld [vmem:[#allocation2] sm:$0xf]  ;;  %v480_v25 = vld [vmem:[#allocation7 + $0x70] ss:$8 sps:$4 sm:$0xff]  }
  0x41   :  { %v478_v24 = vld [vmem:[#allocation7 + $0x74] ss:$8 sps:$4 sm:$0xff]  }
  0x42   :  { %422 = vmatpush3.bf16.msra.mxu0 %v451_v3  ;;  %v383_v27 = vld [vmem:[%s722_s2] ss:$0 sm:$0xff]  ;;  %s617_s2 = smov [#allocation9]  }
  0x43   :  { %423 = vmatprep.subr.bf16.mxu0 %v614_v0  ;;  %291 = vmatpush1.bf16.msra.mxu1 %v465_v11  ;;  %v194_v38 = vld [vmem:[%s724_s4] sm:$0x3]  ;;  %s369_s4 = sshll.u32 %s617_s2, 4  ;;  %s370_s4 = int_to_ptr.vmem [resolvable:$true] %s369_s4 }
  0x44   :  { %292 = vmatprep.subr.bf16.mxu1 %v466_v12  ;;  %v199_v40 = vrot.slane %v194_v38, %v198_v37  ;;  %v203_v41 = vrot.slane %v194_v38, %v202_v39  ;;  %s555_s14 = scalar_lea.vmem %s370_s4, 128  ;;  %p560_p11 = scmp.lt.s32.totalorder %s370_s4, %s370_s4 }
  0x45   :  { %p556_p10 = scmp.ne.s32.totalorder %s370_s4, %s555_s14  ;;  %p561_p12 = scmp.lt.s32.totalorder %s555_s14, %s555_s14 }
  0x46   :  { %424 = vmatpush3.bf16.msra.mxu0 %v452_v6 }
  0x47   :  { %425 = vmatprep.subr.bf16.mxu0 %v614_v0  ;;  %293 = vmatpush1.bf16.msra.mxu1 %v468_v14  ;;  %p562_p13 = por %p561_p12, %p560_p11 }
  0x48   :  { %294 = vmatprep.subr.bf16.mxu1 %v469_v15 }
  0x49   :  { %p563_p0 = pnand %p562_p13, %p556_p10 }
  0x4a   :  { %426 = vmatpush3.bf16.msra.mxu0 %v453_v10 }
  0x4b   :  { %427 = vmatprep.subr.bf16.mxu0 %v614_v0  ;;  %295 = vmatpush1.bf16.msra.mxu1 %v471_v17 }
  0x4c   :  { %296 = vmatprep.subr.bf16.mxu1 %v472_v18 }
  0x4e   :  { %428 = vmatpush3.bf16.msra.mxu0 %v454_v13 }
  0x4f   :  { %429 = vmatprep.subr.bf16.mxu0 %v614_v0  ;;  %297 = vmatpush1.bf16.msra.mxu1 %v474_v20 }
  0x50   :  { %298 = vmatprep.subr.bf16.mxu1 %v475_v21 }
  0x52   :  { %430 = vmatpush3.bf16.msra.mxu0 %v455_v16 }
  0x53   :  { %431 = vmatprep.subr.bf16.mxu0 %v614_v0  ;;  %299 = vmatpush1.bf16.msra.mxu1 %v477_v23 }
  0x54   :  { %300 = vmatprep.subr.bf16.mxu1 %v478_v24 }
  0x56   :  { %432 = vmatpush3.bf16.msra.mxu0 %v456_v19 }
  0x57   :  { %301 = vmatpush1.bf16.msra.mxu1 %v480_v25 }
  0x59   :  { %434 = vmatmul.mubr.bf16.vlgmr.msra.gmra.mrb[0].mxu0 %v64_v22 }
 0x12c   :  { %v170_v28 = vpop.f32.mrb[0].mxu0 }
 0x12d   :  { %v171_v29 = vadd.f32 %v383_v27, %v170_v28  ;;  %v435_v30 = vpop.f32.mrb[1].mxu0 }
 0x12e   :  { %v173_v31 = vpop.f32.mrb[2].mxu0 }
 0x12f   :  { %v176_v32 = vmax.f32 %v171_v29, 0.0  ;;  %v436_v33 = vpop.f32.mrb[3].mxu0 }
 0x131   :  { %v177_v34 = vpack.c.bf16 %v176_v32, %v176_v32 }
 0x133   :  { %319 = vmatmul.mubr.bf16.vlgmr.msra.gmra.mrb[0].mxu1 %v177_v34 }
 0x206   :  { %v320_v42 = vpop.f32.mrb[0].mxu1 }
 0x207   :  { %v321_v43 = vadd.f32 %v320_v42, %v199_v40  ;;  %v322_v44 = vpop.f32.mrb[1].mxu1 }
 0x208   :  { %v323_v45 = vadd.f32 %v322_v44, %v203_v41  ;;  %v324_v46 = vpop.f32.mrb[2].mxu1 }
 0x209   :  { %v325_v47 = vpop.f32.mrb[3].mxu1  ;;  %327 = vmax.xlane.f32.xlu0 %v321_v43 }
 0x20a   :  { %v338_v48 = vand.u32 2147483647, %v323_v45  ;;  %v337_v59 = vmax.f32 %v323_v45, 0.0 }
 0x20c   :  { %v339_v49 = vsub.f32 0.0, %v338_v48 }
 0x20e   :  { %v340_v50 = vmul.f32 1.442695, %v339_v49 }
 0x210   :  { %481 = vpow2.f32 %v340_v50 }
 0x21a   :  { %v482_v51 = vpop.eup %481 }
 0x21b   :  { %v342_v52 = vadd.f32 1.0, %v482_v51  ;;  %v345_v53 = vmul.f32 -0.5, %v482_v51  ;;  %v348_v55 = vand.u32 2147483647, %v482_v51 }
 0x21d   :  { %483 = vlog2.f32 %v342_v52  ;;  %v346_v54 = vadd.f32 1.0, %v345_v53  ;;  %vm349_vm1 = vcmp.lt.f32.partialorder %v348_v55, 0.0004427343 }
 0x21f   :  { %v347_v58 = vmul.f32 %v482_v51, %v346_v54 }
 0x227   :  { %v484_v56 = vpop.eup %483 }
 0x228   :  { %v344_v57 = vmul.f32 0.6931472, %v484_v56 }
 0x22a   :  { %v350_v60 = vsel %vm349_vm1, %v347_v58, %v344_v57 }
 0x22b   :  { %v351_v61 = vadd.f32 %v350_v60, %v337_v59 }
 0x22d   :  { %352 = vst [vmem:[#allocation9] sm:$0xff] %v351_v61 }
 0x296   :  { %v328_v62 = vpop.xlane.xlu0 %327 }
 0x297   :  { %v329_v63 = vsub.f32 %v321_v43, %v328_v62 }
 0x299   :  { %v330_v0 = vmul.f32 1.442695, %v329_v63 }
 0x29b   :  { %485 = vpow2.f32 %v330_v0 }
 0x2a5   :  { %v486_v1 = vpop.eup %485 }
 0x2a6   :  { %332 = vadd.xlane.f32.xlu0 %v486_v1 }
 0x2a7   :  { %566 = shalt.err (!%p563_p0)
}
 0x2a8   :  { %s567_s17 = scalar_lea.hbm %s726_s6, 128 }
 0x2a9   :  { %p568_p1 = scmp.ne.s32.totalorder %s726_s6, %s567_s17  ;;  %p571_p2 = scmp.lt.u32.totalorder %s567_s17, %s726_s6 }
 0x2ab   :  { %p573_p3 = pnand %p571_p2, %p568_p1 }
 0x2ad   :  { %576 = shalt.err (!%p573_p3)
}
 0x2ae   :  { %372 = dma.vmem_to_hbm [thread:$0]  %s370_s4, 128, %s726_s6, [#allocation10]  }
 0x2af   :  { %s618_s23 = smov [#allocation8]  }
 0x2b0   :  { %s359_s24 = sshll.u32 %s618_s23, 4  ;;  %s360_s24 = int_to_ptr.vmem [resolvable:$true] %s359_s24 }
 0x2b1   :  { %s577_s25 = scalar_lea.vmem %s360_s24, 128  ;;  %p582_p5 = scmp.lt.s32.totalorder %s360_s24, %s360_s24 }
 0x2b2   :  { %p578_p4 = scmp.ne.s32.totalorder %s360_s24, %s577_s25  ;;  %p583_p6 = scmp.lt.s32.totalorder %s577_s25, %s577_s25 }
 0x2b4   :  { %p584_p7 = por %p583_p6, %p582_p5 }
 0x2b6   :  { %p585_p8 = pnand %p584_p7, %p578_p4 }
 0x333   :  { %v333_v2 = vpop.xlane.xlu0 %332 }
 0x334   :  { %487 = vrcp.f32 %v333_v2 }
 0x33e   :  { %v488_v3 = vpop.eup %487 }
 0x33f   :  { %v335_v4 = vmul.f32 %v488_v3, %v486_v1 }
 0x341   :  { %336 = vst [vmem:[#allocation8] sm:$0xff] %v335_v4 }
 0x342   :  { %588 = shalt.err (!%p585_p8)
}
 0x343   :  { %s589_s28 = scalar_lea.hbm %s725_s5, 128 }
 0x344   :  { %p590_p9 = scmp.ne.s32.totalorder %s725_s5, %s589_s28  ;;  %p593_p10 = scmp.lt.u32.totalorder %s589_s28, %s725_s5 }
 0x346   :  { %p595_p11 = pnand %p593_p10, %p590_p9 }
 0x348   :  { %598 = shalt.err (!%p595_p11)
}
 0x349   :  { %362 = dma.vmem_to_hbm [thread:$0]  %s360_s24, 128, %s725_s5, [#allocation4]  }
 0x34a   :  { %603 = dma.done.wait [#allocation4], 128  }
 0x34b   :  { %604 = vsyncadd [#allocation4], 4294967168 }
 0x34c   :  { %605 = dma.done.wait [#allocation10], 128  }
 0x34d   :  { %606 = vsyncadd [#allocation10], 4294967168 }
 0x34e   :  { %379 = vsyncpa [#allocation3], 1 }
 0x34f   :  { %380 = vsyncpa [#allocation6], 1 }
 0x350   :  { %381 = vsyncpa [#allocation4], 1 }
 0x351   :  { %382 = vsyncpa [#allocation10], 1 }

</bundles_post_ra>
